<compile_context>
chip_gen: v6e
topology: v6e:2x2x1
jax: 0.10.0
libtpu: 0.0.40
codegen_flags: <defaults>
</compile_context>

<pallas_src>
import jax
import jax.numpy as jnp
from jax.experimental import pallas as pl
from jax.experimental.pallas import tpu as pltpu

IN_FEATURES = 784
HIDDEN1 = 128
HIDDEN2 = 64
OUT_FEATURES = 10
OUT_PAD = 128         # lane-dense output slab; classes 10..127 are masked via bias
NEG_BIG = -1e9        # padded-class bias -> exp underflows to 0 in the softmax sum


def _round_up(n, m):
    return ((n + m - 1) // m) * m


def _mlp_kernel(x_ref, w1_ref, b1_ref, w2_ref, b2_ref, w3_ref, b3_ref, out_ref):
    # x_ref: (BT, 784) f32   w1: (784,128) bf16   w2: (128,64) bf16   w3: (64,128) bf16
    # b1: (1,128) f32   b2: (1,64) f32   b3: (1,128) f32 (lanes 10.. set to -1e9)
    x = x_ref[...].astype(jnp.bfloat16)   # cast in-kernel; no wrapper pad/cast pass

    h1 = jnp.dot(x, w1_ref[...], preferred_element_type=jnp.float32) + b1_ref[...]
    h1 = jnp.maximum(h1, 0.0).astype(jnp.bfloat16)

    h2 = jnp.dot(h1, w2_ref[...], preferred_element_type=jnp.float32) + b2_ref[...]
    h2 = jnp.maximum(h2, 0.0).astype(jnp.bfloat16)

    logits = jnp.dot(h2, w3_ref[...], preferred_element_type=jnp.float32) + b3_ref[...]

    # Numerically-stable log_softmax over the 128-wide slab; padded lanes carry -1e9
    # bias so they never win the max and contribute 0 to the sum.
    m = jnp.max(logits, axis=-1, keepdims=True)
    shifted = logits - m
    lse = jnp.log(jnp.sum(jnp.exp(shifted), axis=-1, keepdims=True))
    out_ref[...] = (shifted - lse).astype(out_ref.dtype)


def prepare_params(params):
    """Cast PyTorch-style f32 params for the kernel (only w3/b3 get class padding)."""
    w1, b1, w2, b2, w3, b3 = params
    w1p = w1.astype(jnp.bfloat16)                                   # (784, 128)
    w2p = w2.astype(jnp.bfloat16)                                   # (128, 64)
    w3p = jnp.pad(w3, ((0, 0), (0, OUT_PAD - OUT_FEATURES))).astype(jnp.bfloat16)
    b1p = b1.astype(jnp.float32)
    b2p = b2.astype(jnp.float32)
    b3p = jnp.pad(b3.astype(jnp.float32), ((0, 0), (0, OUT_PAD - OUT_FEATURES)),
                  constant_values=NEG_BIG)
    return w1p, b1p, w2p, b2p, w3p, b3p


def kmnist_forward(x, params, block_batch=1024):
    """x: any shape flattening to (-1, 784). Returns (B, 10) f32 log-probs."""
    w1p, b1p, w2p, b2p, w3p, b3p = prepare_params(params)

    x2d = x.reshape(-1, IN_FEATURES).astype(jnp.float32)
    B = x2d.shape[0]

    # Megacore-aware batch tile: multiple of 8, capped at block_batch, and sized so the
    # grid has >= 2 tiles whenever the batch is big enough (both v7x TensorCores busy).
    B8 = _round_up(B, 8)
    BT = min(block_batch, _round_up(pl.cdiv(B8, 2), 8))
    BT = max(BT, 8)
    B_pad = _round_up(B8, BT)
    grid_b = B_pad // BT

    # Only pad the batch remainder (features stay at 784 -- no pad/cast pass over x).
    x_in = x2d if B_pad == B else jnp.pad(x2d, ((0, B_pad - B), (0, 0)))

    flops = 2 * B_pad * (IN_FEATURES * HIDDEN1 + HIDDEN1 * HIDDEN2 + HIDDEN2 * OUT_PAD)
    bytes_accessed = (
        B_pad * IN_FEATURES * 4                                            # x (f32)
        + (IN_FEATURES * HIDDEN1 + HIDDEN1 * HIDDEN2 + HIDDEN2 * OUT_PAD) * 2  # weights bf16
        + (HIDDEN1 + HIDDEN2 + OUT_PAD) * 4                                # biases (f32)
        + B_pad * OUT_PAD * 2                                              # output slab bf16
    )

    out_padded = pl.pallas_call(
        _mlp_kernel,
        out_shape=jax.ShapeDtypeStruct((B_pad, OUT_PAD), jnp.bfloat16),
        grid=(grid_b,),
        in_specs=[
            pl.BlockSpec((BT, IN_FEATURES), lambda i: (i, 0)),       # x tile (784 = full dim)
            pl.BlockSpec((IN_FEATURES, HIDDEN1), lambda i: (0, 0)),  # w1 (VMEM-resident)
            pl.BlockSpec((1, HIDDEN1), lambda i: (0, 0)),            # b1
            pl.BlockSpec((HIDDEN1, HIDDEN2), lambda i: (0, 0)),      # w2
            pl.BlockSpec((1, HIDDEN2), lambda i: (0, 0)),            # b2
            pl.BlockSpec((HIDDEN2, OUT_PAD), lambda i: (0, 0)),      # w3
            pl.BlockSpec((1, OUT_PAD), lambda i: (0, 0)),            # b3
        ],
        out_specs=pl.BlockSpec((BT, OUT_PAD), lambda i: (i, 0)),
        compiler_params=pltpu.CompilerParams(
            dimension_semantics=("parallel",),
            vmem_limit_bytes=32 << 20,
        ),
        cost_estimate=pl.CostEstimate(
            flops=flops,
            transcendentals=B_pad * (OUT_PAD + 1),
            bytes_accessed=bytes_accessed,
        ),
    )(x_in, w1p, b1p, w2p, b2p, w3p, b3p)

    return out_padded[:B, :OUT_FEATURES].astype(jnp.float32)


def init_params(key, input_size=784, hidden1=128, hidden2=64, output_size=10):
    """Deterministic init mimicking nn.Linear's U(-1/sqrt(fan_in), 1/sqrt(fan_in)).
    Weights stored as (fan_in, fan_out) so the kernel does x @ W + b."""
    ks = jax.random.split(key, 6)

    def linear(kw, kb, fan_in, fan_out):
        bound = 1.0 / jnp.sqrt(fan_in)
        w = jax.random.uniform(kw, (fan_in, fan_out), jnp.float32, -bound, bound)
        b = jax.random.uniform(kb, (1, fan_out), jnp.float32, -bound, bound)
        return w, b

    w1, b1 = linear(ks[0], ks[1], input_size, hidden1)
    w2, b2 = linear(ks[2], ks[3], hidden1, hidden2)
    w3, b3 = linear(ks[4], ks[5], hidden2, output_size)
    return (w1, b1, w2, b2, w3, b3)


def _reference_forward(x, params):
    """Pure-JAX f32 reference matching the PyTorch module."""
    w1, b1, w2, b2, w3, b3 = params
    x2d = x.reshape(-1, IN_FEATURES).astype(jnp.float32)
    h1 = jnp.maximum(x2d @ w1 + b1, 0.0)
    h2 = jnp.maximum(h1 @ w2 + b2, 0.0)
    logits = h2 @ w3 + b3
    return jax.nn.log_softmax(logits, axis=-1)


if __name__ == "__main__":
    key = jax.random.PRNGKey(0)
    pkey, xkey = jax.random.split(key)

    params = init_params(pkey)
    # KMNIST-like input: NCHW (B, 1, 28, 28); forward flattens to (B, 784).
    x = jax.random.normal(xkey, (8, 1, 28, 28), dtype=jnp.float32)

    out = kmnist_forward(x, params)
    out = jax.block_until_ready(out)

    assert out.shape == (8, 10), out.shape
    # log_softmax rows should exp-sum to ~1
    row_sums = jnp.sum(jnp.exp(out), axis=-1)
    assert jnp.allclose(row_sums, 1.0, atol=1e-2), row_sums
    # Cross-check against a pure-JAX f32 reference (bf16 matmuls/store -> loose tolerance).
    ref = _reference_forward(x, params)
    assert jnp.allclose(out, ref, atol=1e-1), jnp.max(jnp.abs(out - ref))

    print("KERNEL_OK")
</pallas_src>

<mosaic_0001>
module attributes {stable_mosaic.version = 11 : i64} {
  func.func @_mlp_kernel(%arg0: i32, %arg1: memref<8x784xf32, #tpu.memory_space<vmem>>, %arg2: memref<784x128xbf16, #tpu.memory_space<vmem>>, %arg3: memref<1x128xf32, #tpu.memory_space<vmem>>, %arg4: memref<128x64xbf16, #tpu.memory_space<vmem>>, %arg5: memref<1x64xf32, #tpu.memory_space<vmem>>, %arg6: memref<64x128xbf16, #tpu.memory_space<vmem>>, %arg7: memref<1x128xf32, #tpu.memory_space<vmem>>, %arg8: memref<8x128xbf16, #tpu.memory_space<vmem>>) attributes {dimension_semantics = [#tpu.dimension_semantics<parallel>], iteration_bounds = array<i64: 1>, scalar_prefetch = 0 : i64, scratch_operands = 0 : i64, tpu.core_type = #tpu.core_type<tc>, window_params = [{transform_indices = @transform_0, window_bounds = array<i64: 8, 784>}, {pipeline_mode = #tpu.pipeline_mode<synchronous>, transform_indices = @transform_1, window_bounds = array<i64: 784, 128>}, {pipeline_mode = #tpu.pipeline_mode<synchronous>, transform_indices = @transform_2, window_bounds = array<i64: 1, 128>}, {pipeline_mode = #tpu.pipeline_mode<synchronous>, transform_indices = @transform_3, window_bounds = array<i64: 128, 64>}, {pipeline_mode = #tpu.pipeline_mode<synchronous>, transform_indices = @transform_4, window_bounds = array<i64: 1, 64>}, {pipeline_mode = #tpu.pipeline_mode<synchronous>, transform_indices = @transform_5, window_bounds = array<i64: 64, 128>}, {pipeline_mode = #tpu.pipeline_mode<synchronous>, transform_indices = @transform_6, window_bounds = array<i64: 1, 128>}, {transform_indices = @transform_7, window_bounds = array<i64: 8, 128>}]} {
    %c0 = arith.constant 0 : index
    %c0_0 = arith.constant 0 : index
    %0 = vector.load %arg1[%c0, %c0_0] : memref<8x784xf32, #tpu.memory_space<vmem>>, vector<8x784xf32>
    %1 = arith.truncf %0 : vector<8x784xf32> to vector<8x784xbf16>
    %c0_1 = arith.constant 0 : index
    %c0_2 = arith.constant 0 : index
    %2 = vector.load %arg2[%c0_1, %c0_2] : memref<784x128xbf16, #tpu.memory_space<vmem>>, vector<784x128xbf16>
    %cst = arith.constant dense<0.000000e+00> : vector<8x128xf32>
    %3 = tpu.matmul %1, %2, %cst {dimension_numbers = #tpu.dot_dimension_numbers<[1], [0], [0], [1], [0, 0, 1, 1], [], []>} : vector<8x784xbf16>, vector<784x128xbf16>, vector<8x128xf32> -> vector<8x128xf32>
    %c0_3 = arith.constant 0 : index
    %c0_4 = arith.constant 0 : index
    %4 = vector.load %arg3[%c0_3, %c0_4] : memref<1x128xf32, #tpu.memory_space<vmem>>, vector<1x128xf32>
    %5 = vector.broadcast %4 : vector<1x128xf32> to vector<8x128xf32>
    %6 = arith.addf %3, %5 : vector<8x128xf32>
    %cst_5 = arith.constant 0.000000e+00 : f32
    %7 = vector.broadcast %cst_5 : f32 to vector<8x128xf32>
    %8 = arith.maximumf %6, %7 : vector<8x128xf32>
    %9 = arith.truncf %8 : vector<8x128xf32> to vector<8x128xbf16>
    %c0_6 = arith.constant 0 : index
    %c0_7 = arith.constant 0 : index
    %10 = vector.load %arg4[%c0_6, %c0_7] : memref<128x64xbf16, #tpu.memory_space<vmem>>, vector<128x64xbf16>
    %cst_8 = arith.constant dense<0.000000e+00> : vector<8x64xf32>
    %11 = tpu.matmul %9, %10, %cst_8 {dimension_numbers = #tpu.dot_dimension_numbers<[1], [0], [0], [1], [0, 0, 1, 1], [], []>} : vector<8x128xbf16>, vector<128x64xbf16>, vector<8x64xf32> -> vector<8x64xf32>
    %c0_9 = arith.constant 0 : index
    %c0_10 = arith.constant 0 : index
    %12 = vector.load %arg5[%c0_9, %c0_10] : memref<1x64xf32, #tpu.memory_space<vmem>>, vector<1x64xf32>
    %13 = vector.broadcast %12 : vector<1x64xf32> to vector<8x64xf32>
    %14 = arith.addf %11, %13 : vector<8x64xf32>
    %cst_11 = arith.constant 0.000000e+00 : f32
    %15 = vector.broadcast %cst_11 : f32 to vector<8x64xf32>
    %16 = arith.maximumf %14, %15 : vector<8x64xf32>
    %17 = arith.truncf %16 : vector<8x64xf32> to vector<8x64xbf16>
    %c0_12 = arith.constant 0 : index
    %c0_13 = arith.constant 0 : index
    %18 = vector.load %arg6[%c0_12, %c0_13] : memref<64x128xbf16, #tpu.memory_space<vmem>>, vector<64x128xbf16>
    %cst_14 = arith.constant dense<0.000000e+00> : vector<8x128xf32>
    %19 = tpu.matmul %17, %18, %cst_14 {dimension_numbers = #tpu.dot_dimension_numbers<[1], [0], [0], [1], [0, 0, 1, 1], [], []>} : vector<8x64xbf16>, vector<64x128xbf16>, vector<8x128xf32> -> vector<8x128xf32>
    %c0_15 = arith.constant 0 : index
    %c0_16 = arith.constant 0 : index
    %20 = vector.load %arg7[%c0_15, %c0_16] : memref<1x128xf32, #tpu.memory_space<vmem>>, vector<1x128xf32>
    %21 = vector.broadcast %20 : vector<1x128xf32> to vector<8x128xf32>
    %22 = arith.addf %19, %21 : vector<8x128xf32>
    %cst_17 = arith.constant dense<0xFF800000> : vector<8xf32>
    %23 = vector.multi_reduction <maximumf>, %22, %cst_17 [1] : vector<8x128xf32> to vector<8xf32>
    %24 = vector.shape_cast %23 : vector<8xf32> to vector<8x1xf32>
    %25 = vector.broadcast %24 : vector<8x1xf32> to vector<8x128xf32>
    %26 = arith.subf %22, %25 : vector<8x128xf32>
    %27 = math.exp %26 : vector<8x128xf32>
    %cst_18 = arith.constant dense<0.000000e+00> : vector<8xf32>
    %28 = vector.multi_reduction <add>, %27, %cst_18 [1] : vector<8x128xf32> to vector<8xf32>
    %29 = vector.shape_cast %28 : vector<8xf32> to vector<8x1xf32>
    %30 = math.log %29 : vector<8x1xf32>
    %31 = vector.broadcast %30 : vector<8x1xf32> to vector<8x128xf32>
    %32 = arith.subf %26, %31 : vector<8x128xf32>
    %33 = arith.truncf %32 : vector<8x128xf32> to vector<8x128xbf16>
    %c0_19 = arith.constant 0 : index
    %c0_20 = arith.constant 0 : index
    %34 = vector.load %arg8[%c0_19, %c0_20] : memref<8x128xbf16, #tpu.memory_space<vmem>>, vector<8x128xbf16>
    tpu.vector_store %arg8[%c0_19, %c0_20], %33 {strides = array<i32>} : memref<8x128xbf16, #tpu.memory_space<vmem>>, vector<8x128xbf16>,
    return
  }
  func.func @transform_0(%arg0: i32) -> (i32, i32) {
    %c0_i32 = arith.constant 0 : i32
    %c0_i32_0 = arith.constant 0 : i32
    return %arg0, %c0_i32 : i32, i32
  }
  func.func @transform_1(%arg0: i32) -> (i32, i32) {
    %c0_i32 = arith.constant 0 : i32
    %c0_i32_0 = arith.constant 0 : i32
    %c0_i32_1 = arith.constant 0 : i32
    return %c0_i32, %c0_i32_0 : i32, i32
  }
  func.func @transform_2(%arg0: i32) -> (i32, i32) {
    %c0_i32 = arith.constant 0 : i32
    %c0_i32_0 = arith.constant 0 : i32
    %c0_i32_1 = arith.constant 0 : i32
    return %c0_i32, %c0_i32_0 : i32, i32
  }
  func.func @transform_3(%arg0: i32) -> (i32, i32) {
    %c0_i32 = arith.constant 0 : i32
    %c0_i32_0 = arith.constant 0 : i32
    %c0_i32_1 = arith.constant 0 : i32
    return %c0_i32, %c0_i32_0 : i32, i32
  }
  func.func @transform_4(%arg0: i32) -> (i32, i32) {
    %c0_i32 = arith.constant 0 : i32
    %c0_i32_0 = arith.constant 0 : i32
    %c0_i32_1 = arith.constant 0 : i32
    return %c0_i32, %c0_i32_0 : i32, i32
  }
  func.func @transform_5(%arg0: i32) -> (i32, i32) {
    %c0_i32 = arith.constant 0 : i32
    %c0_i32_0 = arith.constant 0 : i32
    %c0_i32_1 = arith.constant 0 : i32
    return %c0_i32, %c0_i32_0 : i32, i32
  }
  func.func @transform_6(%arg0: i32) -> (i32, i32) {
    %c0_i32 = arith.constant 0 : i32
    %c0_i32_0 = arith.constant 0 : i32
    %c0_i32_1 = arith.constant 0 : i32
    return %c0_i32, %c0_i32_0 : i32, i32
  }
  func.func @transform_7(%arg0: i32) -> (i32, i32) {
    %c0_i32 = arith.constant 0 : i32
    %c0_i32_0 = arith.constant 0 : i32
    return %arg0, %c0_i32 : i32, i32
  }
}

</mosaic_0001>

<bundles_post_ra>
// kernel: tpu_custom_call.1
= control target key start
LH: loop header
LB: loop body
LE: loop exit
PB: predicated region body
PF: predicated region fallthrough
CT: control target
= control target key end

     0   :  { %12 = vsyncpa [#allocation3], 0  ;;  %s1282_s0 = inlined_call_operand.vmem [shape: f32[8,784], index: 0, kind: input, shape index: {}]   ;;  %s1283_s1 = inlined_call_operand.hbm [shape: bf16[784,128], index: 1, kind: input, shape index: {}]   ;;  %s1284_s2 = inlined_call_operand.vmem [shape: f32[1,128], index: 2, kind: input, shape index: {}]   ;;  %s1285_s3 = inlined_call_operand.vmem [shape: bf16[128,64], index: 3, kind: input, shape index: {}]   ;;  %s1286_s4 = inlined_call_operand.vmem [shape: f32[1,64], index: 4, kind: input, shape index: {}]   ;;  %s1287_s5 = inlined_call_operand.vmem [shape: bf16[64,128], index: 5, kind: input, shape index: {}]   ;;  %s1288_s6 = inlined_call_operand.vmem [shape: f32[1,128], index: 6, kind: input, shape index: {}]   ;;  %s1289_s7 = inlined_call_operand.hbm [shape: bf16[8,128], index: 7, kind: output, shape index: {}]  }
   0x1   :  { %13 = vsyncpa [#allocation4], 0  ;;  %s1145_s24 = smov [#allocation2]  }
   0x2   :  { %s21_s25 = sshll.u32 %s1145_s24, 4  ;;  %s22_s25 = int_to_ptr.vmem [resolvable:$true] %s21_s25 }
   0x3   :  { %s1109_s26 = scalar_lea.vmem %s22_s25, 6272  ;;  %p1114_p1 = scmp.lt.s32.totalorder %s22_s25, %s22_s25 }
   0x4   :  { %p1110_p0 = scmp.ne.s32.totalorder %s22_s25, %s1109_s26  ;;  %p1115_p2 = scmp.lt.s32.totalorder %s1109_s26, %s1109_s26 }
   0x6   :  { %p1116_p3 = por %p1115_p2, %p1114_p1 }
   0x8   :  { %p1117_p4 = pnand %p1116_p3, %p1110_p0 }
   0xa   :  { %1120 = shalt.err (!%p1117_p4)
}
   0xb   :  { %s1146_s27 = smov 64   ;;  %s1147_s28 = smov 4  }
   0xc   :  { %27 = dma.hbm_to_vmem [thread:$0]  %s1283_s1, 6272, %s22_s25, [#allocation3], %s1146_s27, %s1146_s27, %s1147_s28  }
   0xd   :  { %1141 = dma.done.wait [#allocation3], 6272  }
   0xe   :  { %1142 = vsyncadd [#allocation3], 4294961024  ;;  %v1036_v0 = vld [vmem:[#allocation2 + $0x78] sm:$0xff]   ;;  %v1040_v4 = vld [vmem:[#allocation2 + $0x70] sm:$0xff]   ;;  %v1148_v44 = vmov 0.0   ;;  %vm1149_vm0 = vmmov 0  }
   0xf   :  { %v1037_v1 = vld [vmem:[#allocation2 + $0x38] sm:$0xff]   ;;  %910 = vmatprep.subr.bf16.mxu0 %v1036_v0  ;;  %v1041_v5 = vld [vmem:[#allocation2 + $0x30] sm:$0xff]   ;;  %v1044_v8 = vld [vmem:[#allocation2 + $0x68] sm:$0xff]   ;;  %vm455_vm1 = vcmask 130048   ;;  %vm773_vm2 = vcmask 523264  }
  0x10   :  { %v1038_v2 = vld [vmem:[#allocation2 + $0xf8] sm:$0xff]   ;;  %911 = vmatpush3.bf16.msra.mxu0 %v1037_v1  ;;  %v1042_v6 = vld [vmem:[#allocation2 + $0xf0] sm:$0xff]   ;;  %v1045_v9 = vld [vmem:[#allocation2 + $0x28] sm:$0xff]  }
  0x11   :  { %v1039_v3 = vld [vmem:[#allocation2 + $0xb8] sm:$0xff]   ;;  %932 = vmatprep.subr.bf16.mxu1 %v1038_v2  ;;  %912 = vmatprep.subr.bf16.mxu0 %v1040_v4  ;;  %v1043_v7 = vld [vmem:[#allocation2 + $0xb0] sm:$0xff]   ;;  %v1046_v10 = vld [vmem:[#allocation2 + $0xe8] sm:$0xff]  }
  0x12   :  { %933 = vmatpush3.bf16.msra.mxu1 %v1039_v3  ;;  %v1047_v11 = vld [vmem:[#allocation2 + $0xa8] sm:$0xff]   ;;  %v1048_v12 = vld [vmem:[#allocation2 + $0x60] sm:$0xff]   ;;  %v1052_v16 = vld [vmem:[#allocation2 + $0x58] sm:$0xff]  }
  0x13   :  { %934 = vmatprep.subr.bf16.mxu1 %v1042_v6  ;;  %v1049_v13 = vld [vmem:[#allocation2 + $0x20] sm:$0xff]   ;;  %v1053_v17 = vld [vmem:[#allocation2 + $0x18] sm:$0xff]   ;;  %v1056_v20 = vld [vmem:[#allocation2 + $0x50] sm:$0xff]  }
  0x14   :  { %913 = vmatpush3.bf16.msra.mxu0 %v1041_v5  ;;  %v1050_v14 = vld [vmem:[#allocation2 + $0xe0] sm:$0xff]   ;;  %v1054_v18 = vld [vmem:[#allocation2 + $0xd8] sm:$0xff]   ;;  %v1057_v21 = vld [vmem:[#allocation2 + $0x10] sm:$0xff]  }
  0x15   :  { %914 = vmatprep.subr.bf16.mxu0 %v1044_v8  ;;  %v1051_v15 = vld [vmem:[#allocation2 + $0xa0] sm:$0xff]   ;;  %v1055_v19 = vld [vmem:[#allocation2 + $0x98] sm:$0xff]   ;;  %v1058_v22 = vld [vmem:[#allocation2 + $0xd0] sm:$0xff]  }
  0x16   :  { %935 = vmatpush3.bf16.msra.mxu1 %v1043_v7  ;;  %v1059_v23 = vld [vmem:[#allocation2 + $0x90] sm:$0xff]   ;;  %v1060_v24 = vld [vmem:[#allocation2 + $0x48] sm:$0xff]   ;;  %v1064_v28 = vld [vmem:[#allocation2 + $0x40] sm:$0xff]  }
  0x17   :  { %936 = vmatprep.subr.bf16.mxu1 %v1046_v10  ;;  %v1061_v25 = vld [vmem:[#allocation2 + $0x8] sm:$0xff]   ;;  %v1065_v29 = vld [vmem:[#allocation2] sm:$0xff]   ;;  %v1068_v36 = vld [vmem:[#allocation2 + $0x178] sm:$0xff]  }
  0x18   :  { %915 = vmatpush3.bf16.msra.mxu0 %v1045_v9  ;;  %v1062_v26 = vld [vmem:[#allocation2 + $0xc8] sm:$0xff]   ;;  %v1066_v30 = vld [vmem:[#allocation2 + $0xc0] sm:$0xff]   ;;  %v45_v37 = vld [vmem:[%s1282_s0 + $0x18] sm:$0xff] }
  0x19   :  { %916 = vmatprep.subr.bf16.mxu0 %v1048_v12  ;;  %v1063_v27 = vld [vmem:[#allocation2 + $0x88] sm:$0xff]   ;;  %v1067_v33 = vld [vmem:[#allocation2 + $0x80] sm:$0xff]   ;;  %v52_v38 = vpack.c.bf16 %v45_v37, %v45_v37  ;;  %v1069_v39 = vld [vmem:[#allocation2 + $0x138] sm:$0xff]  }
  0x1a   :  { %937 = vmatpush3.bf16.msra.mxu1 %v1047_v11  ;;  %v43_v31 = vld [vmem:[%s1282_s0 + $0x8] sm:$0xff]  ;;  %v42_v34 = vld [vmem:[%s1282_s0] sm:$0xff]  ;;  %v44_v40 = vld [vmem:[%s1282_s0 + $0x10] sm:$0xff] }
  0x1b   :  { %938 = vmatprep.subr.bf16.mxu1 %v1050_v14  ;;  %v50_v32 = vpack.c.bf16 %v43_v31, %v43_v31  ;;  %v49_v35 = vpack.c.bf16 %v42_v34, %v42_v34  ;;  %531 = vmatprep.mubr.bf16.mxu1 %v52_v38  ;;  %v51_v41 = vpack.c.bf16 %v44_v40, %v44_v40  ;;  %v1070_v42 = vld [vmem:[#allocation2 + $0x170] sm:$0xff]   ;;  %v1072_v45 = vld [vmem:[#allocation2 + $0x168] sm:$0xff]   ;;  %v1074_v47 = vld [vmem:[#allocation2 + $0x160] sm:$0xff]  }
  0x1c   :  { %917 = vmatpush3.bf16.msra.mxu0 %v1049_v13  ;;  %v1071_v43 = vld [vmem:[#allocation2 + $0x130] sm:$0xff]   ;;  %v1073_v46 = vld [vmem:[#allocation2 + $0x128] sm:$0xff]   ;;  %v1075_v48 = vld [vmem:[#allocation2 + $0x120] sm:$0xff]  }
  0x1d   :  { %918 = vmatprep.subr.bf16.mxu0 %v1052_v16  ;;  %491 = vmatprep.mubr.bf16.mxu0 %v50_v32  ;;  %v1076_v49 = vld [vmem:[#allocation2 + $0x158] sm:$0xff]   ;;  %v1078_v51 = vld [vmem:[#allocation2 + $0x150] sm:$0xff]   ;;  %v1084_v53 = vld [vmem:[#allocation2 + $0x180] sm:$0xff]  }
  0x1e   :  { %939 = vmatpush3.bf16.msra.mxu1 %v1051_v15  ;;  %v1077_v50 = vld [vmem:[#allocation2 + $0x118] sm:$0xff]   ;;  %v1079_v52 = vld [vmem:[#allocation2 + $0x110] sm:$0xff]   ;;  %v47_v54 = vld [vmem:[%s1282_s0 + $0x28] sm:$0xff] }
  0x1f   :  { %940 = vmatprep.subr.bf16.mxu1 %v1054_v18  ;;  %v1080_v55 = vld [vmem:[#allocation2 + $0x148] sm:$0xff]   ;;  %v54_v56 = vpack.c.bf16 %v47_v54, %v47_v54  ;;  %v48_v57 = vld [vmem:[%s1282_s0 + $0x30] sm:$0xff]  ;;  %v1082_v60 = vld [vmem:[#allocation2 + $0x140] sm:$0xff]  }
  0x20   :  { %919 = vmatpush3.bf16.msra.mxu0 %v1053_v17  ;;  %v55_v58 = vpack.c.bf16 %v48_v57, %v48_v57  ;;  %v1081_v59 = vld [vmem:[#allocation2 + $0x108] sm:$0xff]   ;;  %v1083_v61 = vld [vmem:[#allocation2 + $0x100] sm:$0xff]   ;;  %v1085_v0 = vld [vmem:[%s1285_s3 + $0x38] sm:$0xff]  }
  0x21   :  { %920 = vmatprep.subr.bf16.mxu0 %v1056_v20  ;;  %v46_v62 = vld [vmem:[%s1282_s0 + $0x20] sm:$0xff]  ;;  %v1086_v1 = vld [vmem:[%s1285_s3 + $0x30] sm:$0xff]   ;;  %v1087_v2 = vld [vmem:[%s1285_s3 + $0x28] sm:$0xff]  }
  0x22   :  { %941 = vmatpush3.bf16.msra.mxu1 %v1055_v19  ;;  %v53_v63 = vpack.c.bf16 %v46_v62, %v46_v62  ;;  %v1088_v3 = vld [vmem:[%s1285_s3 + $0x20] sm:$0xff]   ;;  %v1089_v4 = vld [vmem:[%s1285_s3 + $0x18] sm:$0xff]   ;;  %v1090_v5 = vld [vmem:[%s1285_s3 + $0x10] sm:$0xff]  }
  0x23   :  { %942 = vmatprep.subr.bf16.mxu1 %v1058_v22  ;;  %v1091_v6 = vld [vmem:[%s1285_s3 + $0x8] sm:$0xff]   ;;  %v1092_v7 = vld [vmem:[%s1285_s3] sm:$0xff]   ;;  %v1093_v8 = vld [vmem:[%s1287_s5 + $0x18] sm:$0xff]  }
  0x24   :  { %921 = vmatpush3.bf16.msra.mxu0 %v1057_v21  ;;  %v1094_v9 = vld [vmem:[%s1287_s5 + $0x10] sm:$0xff]   ;;  %v1096_v37 = vld [vmem:[%s1287_s5] sm:$0xff]  }
  0x25   :  { %922 = vmatprep.subr.bf16.mxu0 %v1060_v24  ;;  %v895_v38 = vld [vmem:[%s1286_s4] ss:$0 sm:$0xff]  ;;  %s1150_s4 = smov [#allocation5]  }
  0x26   :  { %943 = vmatpush3.bf16.msra.mxu1 %v1059_v23  ;;  %v844_v23 = vld [vmem:[%s1284_s2] ss:$0 sm:$0xff] }
  0x27   :  { %944 = vmatprep.subr.bf16.mxu1 %v1062_v26 }
  0x28   :  { %923 = vmatpush3.bf16.msra.mxu0 %v1061_v25 }
  0x29   :  { %924 = vmatprep.subr.bf16.mxu0 %v1064_v28 }
  0x2a   :  { %945 = vmatpush3.bf16.msra.mxu1 %v1063_v27 }
  0x2b   :  { %946 = vmatprep.subr.bf16.mxu1 %v1066_v30 }
  0x2c   :  { %925 = vmatpush3.bf16.msra.mxu0 %v1065_v29 }
  0x2d   :  { %954 = vmatprep.subr.bf16.mxu0 %v1068_v36  ;;  %v1095_v36 = vld [vmem:[%s1287_s5 + $0x8] sm:$0xff]   ;;  %s835_s5 = sshll.u32 %s1150_s4, 4  ;;  %s836_s5 = int_to_ptr.vmem [resolvable:$true] %s835_s5 }
  0x2e   :  { %947 = vmatpush3.bf16.msra.mxu1 %v1067_v33  ;;  %p1126_p6 = scmp.lt.s32.totalorder %s836_s5, %s836_s5 }
  0x2f   :  { %492 = vmatmul.mubr.bf16.vlgmr.msra.gmra.mxu0 %v49_v35  ;;  %992 = vmatprep.subr.bf16.mxu1 %v1148_v44 }
  0x30   :  { %955 = vmatpush3.bf16.msra.mxu0 %v1069_v39  ;;  %571 = vmatprep.mubr.bf16.mxu0 %v54_v56 }
  0x31   :  { %532 = vmatmul.mubr.bf16.vlgmr.msra.gmra.mxu1 %v51_v41  ;;  %956 = vmatprep.subr.bf16.mxu0 %v1070_v42 }
  0x32   :  { %994 = vmatprep.mubr.msk.bf16.mxu1 %vm1149_vm0, %v1148_v44  ;;  %993 = vmatpush3.bf16.msra.mxu1 %v1084_v53 }
  0x33   :  { %998 = vmatprep.subr.bf16.mxu1 %v1148_v44 }
  0x34   :  { %957 = vmatpush3.bf16.msra.mxu0 %v1071_v43 }
  0x35   :  { %958 = vmatprep.subr.bf16.mxu0 %v1072_v45 }
  0x38   :  { %959 = vmatpush3.bf16.msra.mxu0 %v1073_v46 }
  0x39   :  { %960 = vmatprep.subr.bf16.mxu0 %v1074_v47  ;;  %995 = vmatmul.mubr.msk.bf16.vlgmr.msra.gmra.mxu1 %vm455_vm1, %v55_v58 }
  0x3a   :  { %1014 = vmatprep.mubr.msk.bf16.mxu1 %vm1149_vm0, %v1148_v44  ;;  %999 = vmatpush3.bf16.msra.mxu1 %v1085_v0 }
  0x3b   :  { %1000 = vmatprep.subr.bf16.mxu1 %v1148_v44 }
  0x3c   :  { %961 = vmatpush3.bf16.msra.mxu0 %v1075_v48 }
  0x3d   :  { %962 = vmatprep.subr.bf16.mxu0 %v1076_v49 }
  0x3e   :  { %1001 = vmatpush3.bf16.msra.mxu1 %v1086_v1 }
  0x3f   :  { %1002 = vmatprep.subr.bf16.mxu1 %v1148_v44 }
  0x40   :  { %963 = vmatpush3.bf16.msra.mxu0 %v1077_v50 }
  0x41   :  { %964 = vmatprep.subr.bf16.mxu0 %v1078_v51 }
  0x42   :  { %1003 = vmatpush3.bf16.msra.mxu1 %v1087_v2 }
  0x43   :  { %1004 = vmatprep.subr.bf16.mxu1 %v1148_v44 }
  0x44   :  { %965 = vmatpush3.bf16.msra.mxu0 %v1079_v52 }
  0x45   :  { %966 = vmatprep.subr.bf16.mxu0 %v1080_v55 }
  0x46   :  { %1005 = vmatpush3.bf16.msra.mxu1 %v1088_v3 }
  0x47   :  { %1006 = vmatprep.subr.bf16.mxu1 %v1148_v44 }
  0x48   :  { %967 = vmatpush3.bf16.msra.mxu0 %v1081_v59 }
  0x49   :  { %968 = vmatprep.subr.bf16.mxu0 %v1082_v60 }
  0x4a   :  { %1007 = vmatpush3.bf16.msra.mxu1 %v1089_v4 }
  0x4b   :  { %1008 = vmatprep.subr.bf16.mxu1 %v1148_v44 }
  0x4c   :  { %969 = vmatpush3.bf16.msra.mxu0 %v1083_v61 }
  0x4d   :  { %1018 = vmatprep.subr.bf16.mxu0 %v1148_v44 }
  0x4e   :  { %1009 = vmatpush3.bf16.msra.mxu1 %v1090_v5 }
  0x4f   :  { %572 = vmatmul.mubr.bf16.vlgmr.msra.gmra.mxu0 %v53_v63  ;;  %1010 = vmatprep.subr.bf16.mxu1 %v1148_v44 }
  0x50   :  { %1026 = vmatprep.mubr.msk.bf16.mxu0 %vm1149_vm0, %v1148_v44  ;;  %1019 = vmatpush3.bf16.msra.mxu0 %v1093_v8 }
  0x51   :  { %1020 = vmatprep.subr.bf16.mxu0 %v1148_v44 }
  0x52   :  { %1011 = vmatpush3.bf16.msra.mxu1 %v1091_v6 }
  0x53   :  { %1012 = vmatprep.subr.bf16.mxu1 %v1148_v44 }
  0x54   :  { %1021 = vmatpush3.bf16.msra.mxu0 %v1094_v9 }
  0x55   :  { %1022 = vmatprep.subr.bf16.mxu0 %v1148_v44 }
  0x56   :  { %1013 = vmatpush3.bf16.msra.mxu1 %v1092_v7 }
  0x58   :  { %1023 = vmatpush3.bf16.msra.mxu0 %v1095_v36 }
  0x59   :  { %1024 = vmatprep.subr.bf16.mxu0 %v1148_v44  ;;  %v904_v44 = vld [vmem:[%s1288_s6] ss:$0 sm:$0xff]  ;;  %s1121_s6 = scalar_lea.vmem %s836_s5, 64 }
  0x5a   :  { %p1122_p5 = scmp.ne.s32.totalorder %s836_s5, %s1121_s6  ;;  %p1127_p7 = scmp.lt.s32.totalorder %s1121_s6, %s1121_s6 }
  0x5c   :  { %1025 = vmatpush3.bf16.msra.mxu0 %v1096_v37  ;;  %p1128_p8 = por %p1127_p7, %p1126_p6 }
  0x5e   :  { %p1129_p9 = pnand %p1128_p8, %p1122_p5 }
  0xef   :  { %v926_v10 = vpop.f32.mrf.mxu0 }
  0xf1   :  { %v927_v11 = vpop.f32.mrf.mxu0  ;;  %v948_v12 = vpop.f32.mrf.mxu1 }
  0xf2   :  { %v928_v22 = vadd.f32 %v927_v11, %v926_v10 }
  0xf3   :  { %v929_v13 = vpop.f32.mrf.mxu0  ;;  %v949_v14 = vpop.f32.mrf.mxu1 }
  0xf4   :  { %v494_v24 = vadd.f32 %v928_v22, %v844_v23  ;;  %v950_v25 = vadd.f32 %v949_v14, %v948_v12 }
  0xf5   :  { %v930_v15 = vpop.f32.mrf.mxu0  ;;  %v951_v16 = vpop.f32.mrf.mxu1 }
  0xf6   :  { %v534_v28 = vadd.f32 %v950_v25, %v494_v24 }
  0xf7   :  { %v952_v17 = vpop.f32.mrf.mxu1 }
  0xf9   :  { %v613_v18 = vpop.f32.mrf.mxu1 }
  0xfb   :  { %v996_v19 = vpop.f32.mrf.mxu1 }
  0xfd   :  { %v616_v20 = vpop.f32.mrf.mxu1 }
  0xff   :  { %v997_v21 = vpop.f32.mrf.mxu1 }
 0x10f   :  { %v970_v26 = vpop.f32.mrf.mxu0 }
 0x111   :  { %v971_v27 = vpop.f32.mrf.mxu0 }
 0x112   :  { %v972_v29 = vadd.f32 %v971_v27, %v970_v26 }
 0x113   :  { %v973_v30 = vpop.f32.mrf.mxu0 }
 0x114   :  { %v574_v31 = vadd.f32 %v972_v29, %v534_v28 }
 0x115   :  { %v974_v32 = vpop.f32.mrf.mxu0 }
 0x116   :  { %v614_v33 = vadd.f32 %v613_v18, %v574_v31 }
 0x118   :  { %v619_v34 = vmax.f32 %v614_v33, 0.0 }
 0x11a   :  { %v620_v35 = vpack.c.bf16 %v619_v34, %v619_v34 }
 0x11c   :  { %1015 = vmatmul.mubr.bf16.vlgmr.msra.gmra.mxu1 %v620_v35 }
 0x1dc   :  { %v726_v39 = vpop.f32.mrf.mxu1 }
 0x1dd   :  { %v727_v40 = vadd.f32 %v895_v38, %v726_v39 }
 0x1de   :  { %v1016_v41 = vpop.f32.mrf.mxu1 }
 0x1df   :  { %v732_v42 = vmax.f32 %v727_v40, 0.0 }
 0x1e0   :  { %v729_v43 = vpop.f32.mrf.mxu1 }
 0x1e1   :  { %v733_v45 = vpack.c.bf16 %v732_v42, %v732_v42 }
 0x1e2   :  { %v1017_v46 = vpop.f32.mrf.mxu1 }
 0x1e3   :  { %1027 = vmatmul.mubr.msk.bf16.vlgmr.msra.gmra.mxu0 %vm773_vm2, %v733_v45 }
 0x2a3   :  { %v811_v47 = vpop.f32.mrf.mxu0 }
 0x2a4   :  { %v812_v48 = vadd.f32 %v904_v44, %v811_v47 }
 0x2a5   :  { %v1028_v49 = vpop.f32.mrf.mxu0 }
 0x2a6   :  { %817 = vmax.xlane.f32.xlu0 %v812_v48 }
 0x2a7   :  { %v814_v50 = vpop.f32.mrf.mxu0 }
 0x2a9   :  { %v1029_v51 = vpop.f32.mrf.mxu0 }
 0x32f   :  { %v818_v52 = vpop.xlane.xlu0 %817 }
 0x330   :  { %v819_v53 = vsub.f32 %v812_v48, %v818_v52 }
 0x332   :  { %v820_v54 = vmul.f32 1.442695, %v819_v53 }
 0x334   :  { %1097 = vpow2.f32 %v820_v54 }
 0x341   :  { %v1098_v55 = vpop.eup %1097 }
 0x342   :  { %822 = vadd.xlane.f32.xlu0 %v1098_v55 }
 0x3cb   :  { %v823_v56 = vpop.xlane.xlu0 %822 }
 0x3cc   :  { %1099 = vlog2.f32 %v823_v56 }
 0x3d9   :  { %v1100_v57 = vpop.eup %1099 }
 0x3da   :  { %v825_v58 = vmul.f32 0.6931472, %v1100_v57 }
 0x3dc   :  { %v826_v59 = vsub.f32 %v819_v53, %v825_v58 }
 0x3de   :  { %v827_v60 = vpack.c.bf16 %v826_v59, %v826_v59 }
 0x3e0   :  { %828 = vst [vmem:[#allocation5] sm:$0xf] %v827_v60 }
 0x3e1   :  { %1132 = shalt.err (!%p1129_p9)
}
 0x3e2   :  { %838 = dma.vmem_to_hbm [thread:$0]  %s836_s5, 64, %s1289_s7, [#allocation4]  }
 0x3e3   :  { %1143 = dma.done.wait [#allocation4], 64  }
 0x3e4   :  { %1144 = vsyncadd [#allocation4], 4294967232 }
 0x3e5   :  { %842 = vsyncpa [#allocation3], 1 }
 0x3e6   :  { %843 = vsyncpa [#allocation4], 1 }

</bundles_post_ra>
